<compile_context>
chip_gen: v6e
topology: v6e:2x2x1
jax: 0.10.0
libtpu: 0.0.40
codegen_flags: <defaults>
</compile_context>

<pallas_src>
import jax
import jax.numpy as jnp
from jax.experimental import pallas as pl
from jax.experimental.pallas import tpu as pltpu


# --------------------------------------------------------------------------
# Kernel
# --------------------------------------------------------------------------
def _attention_kernel(enc_ref, wa_ref, ba_ref, wv_ref, ctx_ref):
    # enc_ref : (tb, S, 2H)  batch tile of encoder outputs (native dtype)
    # wa_ref  : (2H, H)      attn.weight, pre-transposed wrapper-side
    # ba_ref  : (1, H)       attn.bias
    # wv_ref  : (1, H)       v.weight
    # ctx_ref : (tb, 2H)     context rows for this batch tile
    tb, S, H2 = enc_ref.shape
    H = wa_ref.shape[1]
    e = enc_ref[...]                                          # (tb, S, 2H)

    # tanh(self.attn(encoder_outputs)): one flattened GEMM on the MXU
    # (M = tb*S rows), f32 accumulation; bias + tanh in f32.
    h = jnp.dot(e.reshape(tb * S, H2), wa_ref[...],
                preferred_element_type=jnp.float32)           # (tb*S, H) f32
    h = jnp.tanh(h + ba_ref[...].astype(jnp.float32))
    h = h.reshape(tb, S, H)                                   # (tb, S, H) f32

    # self.v(h).squeeze(-1): N=1 projection on the VPU (mul + lane reduce),
    # scores land lane-dense as (tb, S).
    scores = jnp.sum(h * wv_ref[...].astype(jnp.float32), axis=-1)   # (tb, S)

    # softmax over the sequence axis (PyTorch dim=1), numerically stable,
    # exact reciprocal for parity with the reference module.
    m = jnp.max(scores, axis=-1, keepdims=True)               # (tb, 1)
    p = jnp.exp(scores - m)                                   # (tb, S)
    w = p / jnp.sum(p, axis=-1, keepdims=True)                # (tb, S) f32

    # context = sum_s w[b, s] * encoder_outputs[b, s, :]
    # Multiply in the native dtype (no full f32 copy of the encoder tile);
    # accumulate the S-reduction in f32.
    if e.dtype == jnp.float32:
        ctx = jnp.sum(w[:, :, None] * e, axis=1)              # (tb, 2H) f32
    else:
        ctx = jnp.sum(w.astype(e.dtype)[:, :, None] * e, axis=1,
                      dtype=jnp.float32)
    ctx_ref[...] = ctx.astype(ctx_ref.dtype)


# --------------------------------------------------------------------------
# Tiling / VMEM heuristics
# --------------------------------------------------------------------------
def _round_up(x, m):
    return ((x + m - 1) // m) * m


def _physical_vmem_bytes():
    """Per-core VMEM capacity; conservative v7x-sized fallback (64 MiB)."""
    try:
        info = pltpu.get_tpu_info()
        for attr in ("vmem_capacity_bytes", "vmem_size_bytes", "vmem_bytes"):
            v = getattr(info, attr, None)
            if isinstance(v, int) and v > 0:
                return v
    except Exception:
        pass
    return 64 << 20


def _vmem_limits():
    """(scoped vmem_limit_bytes, per-step tile budget)."""
    phys = _physical_vmem_bytes()
    scoped = max(32 << 20, min(phys - (16 << 20), 96 << 20))
    tile_budget = (scoped * 3) // 4          # headroom for compiler temporaries
    return scoped, tile_budget


def _estimate_step_vmem(tb, S, H2, itemsize):
    """Everything live per grid step: double-buffered input/output blocks,
    weight blocks, and the f32 intermediates the kernel body materializes."""
    H = H2 // 2
    f32 = 4
    enc_in = 2 * tb * S * H2 * itemsize              # double-buffered encoder
    out = 2 * tb * H2 * itemsize                     # double-buffered context
    wts = 2 * (H2 * H + 2 * H) * itemsize            # weights / bias blocks
    act = tb * S * H * f32                           # tanh activations (f32)
    prod = tb * S * H2 * max(itemsize, f32)          # w * e product
    small = 6 * tb * S * f32 + tb * H2 * f32         # scores / softmax / ctx
    return int(1.25 * (enc_in + out + wts + act + prod + small))


def _choose_batch_tile(B, S, H2, dtype, tile_budget):
    """Pick (batch tile, padded batch)."""
    itemsize = jnp.dtype(dtype).itemsize
    pack = {4: 8, 2: 16, 1: 32}.get(itemsize, 8)     # dtype sublane pack
    b_pad = _round_up(B, pack)

    # Largest pack-aligned tile whose per-step footprint fits the budget.
    tb_max = pack
    t = 2 * pack
    while t <= b_pad and _estimate_step_vmem(t, S, H2, itemsize) <= tile_budget:
        tb_max = t
        t += pack

    # (a) fill the MXU M dimension: tb*S >= ~256 rows when possible,
    # (b) keep >= ~4 grid steps so DMA of tile i+1 overlaps compute of tile i
    #     and (on v7x) both TensorCores get batch tiles.
    tb_fill = _round_up(-(-256 // max(S, 1)), pack)
    tb_overlap = _round_up(-(-b_pad // 4), pack)
    tb = min(tb_max, max(tb_fill, tb_overlap))
    tb = max(pack, min(tb, b_pad))

    b_pad = _round_up(b_pad, tb)                     # full tiles only
    return tb, b_pad


# --------------------------------------------------------------------------
# Wrapper
# --------------------------------------------------------------------------
def attention_forward(hidden, encoder_outputs, attn_w, attn_b, v_w):
    """Pallas version of Attention.forward.

    hidden          : (B, H)      -- unused (matches the PyTorch forward)
    encoder_outputs : (B, S, 2H)
    attn_w          : (H, 2H)     PyTorch Linear weight (out_features, in_features)
    attn_b          : (H,)
    v_w             : (1, H)
    returns         : (B, 2H) context
    """
    del hidden  # unused in the reference forward
    B, S, H2 = encoder_outputs.shape
    H = H2 // 2
    dtype = encoder_outputs.dtype

    # One-time layout prep outside the kernel (single XLA ops, not per-step):
    attn_wt = attn_w.T.astype(dtype)       # (2H, H) pre-transposed MXU feed
    attn_b2 = attn_b.reshape(1, H)         # (1, H)
    v_w2 = v_w.reshape(1, H)               # (1, H)

    scoped_vmem, tile_budget = _vmem_limits()
    tb, b_pad = _choose_batch_tile(B, S, H2, dtype, tile_budget)

    enc = encoder_outputs
    if b_pad != B:
        enc = jnp.pad(enc, ((0, b_pad - B), (0, 0), (0, 0)))

    grid = (b_pad // tb,)

    # 3-deep input pipelining only on the 128 MiB-VMEM parts (v5e/v6e) and only
    # when the grid is long enough for it to matter; keep default depth 2 on v7x.
    enc_spec_kwargs = {}
    if _physical_vmem_bytes() >= (128 << 20) and grid[0] >= 3:
        enc_spec_kwargs["pipeline_mode"] = pl.Buffered(3)

    out = pl.pallas_call(
        _attention_kernel,
        out_shape=jax.ShapeDtypeStruct((b_pad, H2), dtype),
        grid_spec=pltpu.PrefetchScalarGridSpec(
            num_scalar_prefetch=0,
            grid=grid,
            in_specs=[
                pl.BlockSpec((tb, S, H2), lambda b: (b, 0, 0),
                             **enc_spec_kwargs),                 # encoder tile
                pl.BlockSpec((H2, H), lambda b: (0, 0)),         # attn.weight^T
                pl.BlockSpec((1, H), lambda b: (0, 0)),          # attn.bias
                pl.BlockSpec((1, H), lambda b: (0, 0)),          # v.weight
            ],
            out_specs=pl.BlockSpec((tb, H2), lambda b: (b, 0)),  # lane-dense rows
        ),
        compiler_params=pltpu.CompilerParams(
            dimension_semantics=("parallel",),
            vmem_limit_bytes=scoped_vmem,
        ),
    )(enc, attn_wt, attn_b2, v_w2)

    return out[:B] if b_pad != B else out


# --------------------------------------------------------------------------
# Pure-JAX reference (mirrors the PyTorch module)
# --------------------------------------------------------------------------
def _reference_forward(hidden, encoder_outputs, attn_w, attn_b, v_w):
    del hidden
    aw = jnp.tanh(jnp.einsum("bsk,hk->bsh", encoder_outputs, attn_w) + attn_b)
    scores = jnp.einsum("bsh,oh->bso", aw, v_w)[..., 0]        # (B, S)
    scores = jax.nn.softmax(scores, axis=1)
    return jnp.sum(scores[..., None] * encoder_outputs, axis=1)


if __name__ == "__main__":
    B, S, H = 2, 8, 32   # batch, sequence length, hidden_size
    H2 = 2 * H

    key = jax.random.PRNGKey(0)
    k_enc, k_hid, k_wa, k_ba, k_wv = jax.random.split(key, 5)

    encoder_outputs = jax.random.normal(k_enc, (B, S, H2), dtype=jnp.float32)
    hidden = jax.random.normal(k_hid, (B, H), dtype=jnp.float32)  # unused

    # Deterministic parameter init (PyTorch Linear-style uniform bounds).
    bound_attn = 1.0 / jnp.sqrt(jnp.float32(H2))
    attn_w = jax.random.uniform(k_wa, (H, H2), jnp.float32, -bound_attn, bound_attn)
    attn_b = jax.random.uniform(k_ba, (H,), jnp.float32, -bound_attn, bound_attn)
    bound_v = 1.0 / jnp.sqrt(jnp.float32(H))
    v_w = jax.random.uniform(k_wv, (1, H), jnp.float32, -bound_v, bound_v)

    ctx = attention_forward(hidden, encoder_outputs, attn_w, attn_b, v_w)
    ctx = jax.block_until_ready(ctx)

    ref = _reference_forward(hidden, encoder_outputs, attn_w, attn_b, v_w)
    assert ctx.shape == (B, H2)
    assert jnp.allclose(ctx, ref, atol=1e-4, rtol=1e-4), "mismatch vs reference"

    print("KERNEL_OK")
</pallas_src>

<mosaic_0001>
module attributes {stable_mosaic.version = 11 : i64} {
  func.func @_attention_kernel(%arg0: i32, %arg1: memref<8x8x64xf32, #tpu.memory_space<vmem>>, %arg2: memref<64x32xf32, #tpu.memory_space<vmem>>, %arg3: memref<1x32xf32, #tpu.memory_space<vmem>>, %arg4: memref<1x32xf32, #tpu.memory_space<vmem>>, %arg5: memref<8x64xf32, #tpu.memory_space<vmem>>) attributes {dimension_semantics = [#tpu.dimension_semantics<parallel>], iteration_bounds = array<i64: 1>, scalar_prefetch = 0 : i64, scratch_operands = 0 : i64, tpu.core_type = #tpu.core_type<tc>, window_params = [{transform_indices = @transform_0, window_bounds = array<i64: 8, 8, 64>}, {pipeline_mode = #tpu.pipeline_mode<synchronous>, transform_indices = @transform_1, window_bounds = array<i64: 64, 32>}, {pipeline_mode = #tpu.pipeline_mode<synchronous>, transform_indices = @transform_2, window_bounds = array<i64: 1, 32>}, {pipeline_mode = #tpu.pipeline_mode<synchronous>, transform_indices = @transform_3, window_bounds = array<i64: 1, 32>}, {transform_indices = @transform_4, window_bounds = array<i64: 8, 64>}]} {
    %c0 = arith.constant 0 : index
    %c0_0 = arith.constant 0 : index
    %c0_1 = arith.constant 0 : index
    %0 = vector.load %arg1[%c0, %c0_0, %c0_1] : memref<8x8x64xf32, #tpu.memory_space<vmem>>, vector<8x8x64xf32>
    %1 = vector.shape_cast %0 : vector<8x8x64xf32> to vector<64x64xf32>
    %c0_2 = arith.constant 0 : index
    %c0_3 = arith.constant 0 : index
    %2 = vector.load %arg2[%c0_2, %c0_3] : memref<64x32xf32, #tpu.memory_space<vmem>>, vector<64x32xf32>
    %cst = arith.constant dense<0.000000e+00> : vector<64x32xf32>
    %3 = tpu.matmul %1, %2, %cst {dimension_numbers = #tpu.dot_dimension_numbers<[1], [0], [0], [1], [0, 0, 1, 1], [], []>} : vector<64x64xf32>, vector<64x32xf32>, vector<64x32xf32> -> vector<64x32xf32>
    %c0_4 = arith.constant 0 : index
    %c0_5 = arith.constant 0 : index
    %4 = vector.load %arg3[%c0_4, %c0_5] : memref<1x32xf32, #tpu.memory_space<vmem>>, vector<1x32xf32>
    %5 = vector.broadcast %4 : vector<1x32xf32> to vector<64x32xf32>
    %6 = arith.addf %3, %5 : vector<64x32xf32>
    %7 = math.tanh %6 : vector<64x32xf32>
    %8 = vector.shape_cast %7 : vector<64x32xf32> to vector<8x8x32xf32>
    %c0_6 = arith.constant 0 : index
    %c0_7 = arith.constant 0 : index
    %9 = vector.load %arg4[%c0_6, %c0_7] : memref<1x32xf32, #tpu.memory_space<vmem>>, vector<1x32xf32>
    %10 = vector.shape_cast %9 : vector<1x32xf32> to vector<1x1x32xf32>
    %11 = vector.broadcast %10 : vector<1x1x32xf32> to vector<8x8x32xf32>
    %12 = arith.mulf %8, %11 : vector<8x8x32xf32>
    %cst_8 = arith.constant dense<0.000000e+00> : vector<8x8xf32>
    %13 = vector.multi_reduction <add>, %12, %cst_8 [2] : vector<8x8x32xf32> to vector<8x8xf32>
    %cst_9 = arith.constant dense<0xFF800000> : vector<8xf32>
    %14 = vector.multi_reduction <maximumf>, %13, %cst_9 [1] : vector<8x8xf32> to vector<8xf32>
    %15 = vector.shape_cast %14 : vector<8xf32> to vector<8x1xf32>
    %16 = vector.broadcast %15 : vector<8x1xf32> to vector<8x8xf32>
    %17 = arith.subf %13, %16 : vector<8x8xf32>
    %18 = math.exp %17 : vector<8x8xf32>
    %cst_10 = arith.constant dense<0.000000e+00> : vector<8xf32>
    %19 = vector.multi_reduction <add>, %18, %cst_10 [1] : vector<8x8xf32> to vector<8xf32>
    %20 = vector.shape_cast %19 : vector<8xf32> to vector<8x1xf32>
    %21 = vector.broadcast %20 : vector<8x1xf32> to vector<8x8xf32>
    %22 = arith.divf %18, %21 : vector<8x8xf32>
    %23 = vector.shape_cast %22 : vector<8x8xf32> to vector<8x8x1xf32>
    %24 = vector.broadcast %23 : vector<8x8x1xf32> to vector<8x8x64xf32>
    %25 = arith.mulf %24, %0 : vector<8x8x64xf32>
    %cst_11 = arith.constant dense<0.000000e+00> : vector<8x64xf32>
    %26 = vector.multi_reduction <add>, %25, %cst_11 [1] : vector<8x8x64xf32> to vector<8x64xf32>
    %c0_12 = arith.constant 0 : index
    %c0_13 = arith.constant 0 : index
    %27 = vector.load %arg5[%c0_12, %c0_13] : memref<8x64xf32, #tpu.memory_space<vmem>>, vector<8x64xf32>
    tpu.vector_store %arg5[%c0_12, %c0_13], %26 {strides = array<i32>} : memref<8x64xf32, #tpu.memory_space<vmem>>, vector<8x64xf32>,
    return
  }
  func.func @transform_0(%arg0: i32) -> (i32, i32, i32) {
    %c0_i32 = arith.constant 0 : i32
    %c0_i32_0 = arith.constant 0 : i32
    %c0_i32_1 = arith.constant 0 : i32
    return %arg0, %c0_i32, %c0_i32_0 : i32, i32, i32
  }
  func.func @transform_1(%arg0: i32) -> (i32, i32) {
    %c0_i32 = arith.constant 0 : i32
    %c0_i32_0 = arith.constant 0 : i32
    %c0_i32_1 = arith.constant 0 : i32
    return %c0_i32, %c0_i32_0 : i32, i32
  }
  func.func @transform_2(%arg0: i32) -> (i32, i32) {
    %c0_i32 = arith.constant 0 : i32
    %c0_i32_0 = arith.constant 0 : i32
    %c0_i32_1 = arith.constant 0 : i32
    return %c0_i32, %c0_i32_0 : i32, i32
  }
  func.func @transform_3(%arg0: i32) -> (i32, i32) {
    %c0_i32 = arith.constant 0 : i32
    %c0_i32_0 = arith.constant 0 : i32
    %c0_i32_1 = arith.constant 0 : i32
    return %c0_i32, %c0_i32_0 : i32, i32
  }
  func.func @transform_4(%arg0: i32) -> (i32, i32) {
    %c0_i32 = arith.constant 0 : i32
    %c0_i32_0 = arith.constant 0 : i32
    return %arg0, %c0_i32 : i32, i32
  }
}

</mosaic_0001>

<bundles_post_ra>
// kernel: tpu_custom_call.1
= control target key start
LH: loop header
LB: loop body
LE: loop exit
PB: predicated region body
PF: predicated region fallthrough
CT: control target
= control target key end

     0   :  { %s1009_s0 = inlined_call_operand.vmem [shape: f32[8,8,64], index: 0, kind: input, shape index: {}]   ;;  %s1010_s1 = inlined_call_operand.vmem [shape: f32[64,32], index: 1, kind: input, shape index: {}]   ;;  %s1011_s2 = inlined_call_operand.vmem [shape: f32[1,32], index: 2, kind: input, shape index: {}]   ;;  %s1012_s3 = inlined_call_operand.vmem [shape: f32[1,32], index: 3, kind: input, shape index: {}]   ;;  %s1013_s4 = inlined_call_operand.hbm [shape: f32[8,64], index: 4, kind: output, shape index: {}]  }
   0x1   :  { %v33_v0 = vld [vmem:[%s1010_s1 + $0x38] sm:$0xff]  ;;  %v32_v1 = vld [vmem:[%s1010_s1 + $0x30] sm:$0xff]  ;;  %v31_v2 = vld [vmem:[%s1010_s1 + $0x28] sm:$0xff] }
   0x2   :  { %638 = vmatprep.subr.mxu0 %v33_v0  ;;  %666 = vmatprep.subr.mxu1 %v33_v0  ;;  %v30_v3 = vld [vmem:[%s1010_s1 + $0x20] sm:$0xff] }
   0x3   :  { %639 = vmatpush3.msra.mxu0 %v33_v0  ;;  %674 = vmatpush3.msra.mxu1 %v33_v0 }
   0x4   :  { %640 = vmatprep.subr.mxu0 %v32_v1  ;;  %667 = vmatprep.subr.mxu1 %v32_v1 }
   0x5   :  { %641 = vmatpush3.msra.mxu0 %v32_v1  ;;  %675 = vmatpush3.msra.mxu1 %v32_v1 }
   0x6   :  { %642 = vmatprep.subr.mxu0 %v31_v2  ;;  %668 = vmatprep.subr.mxu1 %v31_v2 }
   0x7   :  { %9 = vsyncpa [#allocation3], 0  ;;  %643 = vmatpush3.msra.mxu0 %v31_v2  ;;  %v29_v4 = vld [vmem:[%s1010_s1 + $0x18] sm:$0xff]  ;;  %676 = vmatpush3.msra.mxu1 %v31_v2  ;;  %v801_v5 = vld [vmem:[%s1009_s0] sm:$0xff]  ;;  %vm41_vm0 = vcmask 523264   ;;  %vm194_vm1 = vcmask 261120   ;;  %v227_v58 = vlaneseq }
   0x8   :  { %644 = vmatprep.subr.mxu0 %v30_v3  ;;  %669 = vmatprep.subr.mxu1 %v30_v3  ;;  %v28_v6 = vld [vmem:[%s1010_s1 + $0x10] sm:$0xff]  ;;  %v27_v7 = vld [vmem:[%s1010_s1 + $0x8] sm:$0xff]  ;;  %v26_v8 = vld [vmem:[%s1010_s1] sm:$0xff]  ;;  %vm261_vm2 = vcmask 1041409   ;;  %vm263_vm3 = vcmask 1042434   ;;  %vm265_vm4 = vcmask 1043459  }
   0x9   :  { %645 = vmatpush3.msra.mxu0 %v30_v3  ;;  %677 = vmatpush3.msra.mxu1 %v30_v3  ;;  %v817_v9 = vld [vmem:[%s1009_s0 + $0x8] sm:$0xff]  ;;  %v822_v10 = vld [vmem:[%s1009_s0 + $0x10] sm:$0xff]  ;;  %v827_v11 = vld [vmem:[%s1009_s0 + $0x20] sm:$0xff]  ;;  %v228_v59 = vand.u32 127, %v227_v58  ;;  %v877_v60 = vshrl.u32 %v227_v58, 7  ;;  %vm267_vm5 = vcmask 1044484  }
   0xa   :  { %646 = vmatprep.subr.mxu0 %v29_v4  ;;  %670 = vmatprep.subr.mxu1 %v29_v4  ;;  %v832_v12 = vld [vmem:[%s1009_s0 + $0x28] sm:$0xff]  ;;  %v839_v13 = vld [vmem:[%s1009_s0 + $0x30] sm:$0xff]  ;;  %v846_v14 = vld [vmem:[%s1009_s0 + $0x18] sm:$0xff]  ;;  %vm269_vm6 = vcmask 1045509   ;;  %vm271_vm7 = vcmask 1046534   ;;  %vm273_vm8 = vcmask 1047559  }
   0xb   :  { %647 = vmatpush3.msra.mxu0 %v29_v4  ;;  %654 = vmatprep.mubr.msk.f32.mxu0 %vm41_vm0, %v801_v5  ;;  %v857_v15 = vld [vmem:[%s1009_s0 + $0x38] sm:$0xff]  ;;  %v612_v16 = vld [vmem:[%s1011_s2] ss:$0 sm:$0xff]  ;;  %v880_v62 = vsub.s32 %v228_v59, %v877_v60  ;;  %vm276_vm9 = vcmask 64512  }
   0xc   :  { %648 = vmatprep.subr.mxu0 %v28_v6  ;;  %678 = vmatpush3.msra.mxu1 %v29_v4  ;;  %v621_v33 = vld [vmem:[%s1012_s3] ss:$0 sm:$0xff]  ;;  %s757_s3 = smov [#allocation2]  }
   0xd   :  { %649 = vmatpush3.msra.mxu0 %v28_v6  ;;  %671 = vmatprep.subr.mxu1 %v28_v6  ;;  %s604_s22 = sshll.u32 %s757_s3, 4  ;;  %s605_s22 = int_to_ptr.vmem [resolvable:$true] %s604_s22 }
   0xe   :  { %650 = vmatprep.subr.mxu0 %v27_v7  ;;  %679 = vmatpush3.msra.mxu1 %v28_v6  ;;  %s734_s23 = scalar_lea.vmem %s605_s22, 128  ;;  %p739_p1 = scmp.lt.s32.totalorder %s605_s22, %s605_s22 }
   0xf   :  { %651 = vmatpush3.msra.mxu0 %v27_v7  ;;  %672 = vmatprep.subr.mxu1 %v27_v7  ;;  %p735_p0 = scmp.ne.s32.totalorder %s605_s22, %s734_s23  ;;  %p740_p2 = scmp.lt.s32.totalorder %s734_s23, %s734_s23 }
  0x10   :  { %652 = vmatprep.subr.mxu0 %v26_v8  ;;  %680 = vmatpush3.msra.mxu1 %v27_v7 }
  0x11   :  { %653 = vmatpush3.msra.mxu0 %v26_v8  ;;  %673 = vmatprep.subr.mxu1 %v26_v8  ;;  %p741_p3 = por %p740_p2, %p739_p1 }
  0x12   :  { %655 = vmatmul.mubr.msk.f32.vlgmr.msra.gmra.mxu0 %vm41_vm0, %v817_v9  ;;  %681 = vmatpush3.msra.mxu1 %v26_v8 }
  0x13   :  { %657 = vmatprep.mubr.msk.f32.mxu0 %vm41_vm0, %v822_v10  ;;  %660 = vmatprep.mubr.msk.f32.mxu1 %vm41_vm0, %v827_v11  ;;  %p742_p4 = pnand %p741_p3, %p735_p0 }
  0x14   :  { %661 = vmatmul.mubr.msk.f32.vlgmr.msra.gmra.mxu1 %vm41_vm0, %v832_v12 }
  0x15   :  { %663 = vmatprep.mubr.msk.f32.mxu1 %vm41_vm0, %v839_v13 }
  0x16   :  { %658 = vmatmul.mubr.msk.f32.gmra.mxu0 %vm41_vm0, %v846_v14 }
  0x18   :  { %664 = vmatmul.mubr.msk.f32.gmra.mxu1 %vm41_vm0, %v857_v15 }
  0xd2   :  { %v656_v17 = vpop.f32.mrf.mxu0 }
  0xd3   :  { %v138_v18 = vadd.f32 %v656_v17, %v612_v16 }
  0xd4   :  { %v132_v19 = vpop.f32.mrf.mxu0  ;;  %v662_v20 = vpop.f32.mrf.mxu1 }
  0xd5   :  { %686 = vtanh.f32 %v138_v18  ;;  %v133_v21 = vadd.f32 %v612_v16, %v132_v19  ;;  %v158_v27 = vadd.f32 %v662_v20, %v612_v16 }
  0xd6   :  { %v659_v22 = vpop.f32.mrf.mxu0  ;;  %v152_v23 = vpop.f32.mrf.mxu1 }
  0xd7   :  { %688 = vtanh.f32 %v133_v21  ;;  %v148_v24 = vadd.f32 %v659_v22, %v612_v16  ;;  %v153_v25 = vadd.f32 %v612_v16, %v152_v23 }
  0xd8   :  { %v142_v26 = vpop.f32.mrf.mxu0  ;;  %v665_v28 = vpop.f32.mrf.mxu1 }
  0xd9   :  { %690 = vtanh.f32 %v148_v24  ;;  %v143_v29 = vadd.f32 %v612_v16, %v142_v26  ;;  %v168_v32 = vadd.f32 %v665_v28, %v612_v16 }
  0xda   :  { %692 = vtanh.f32 %v153_v25  ;;  %v162_v30 = vpop.f32.mrf.mxu1 }
  0xdb   :  { %694 = vtanh.f32 %v143_v29  ;;  %v163_v31 = vadd.f32 %v612_v16, %v162_v30  ;;  %v756_v30 = vmov 0  }
  0xdc   :  { %696 = vtanh.f32 %v158_v27  ;;  %685 = vset.pattern.permute.xlu0 %v756_v30  ;;  %684 = vset.pattern.permute.xlu1 %v756_v30 }
  0xdd   :  { %698 = vtanh.f32 %v163_v31  ;;  %v283_v31 = vsub.s32 0, %v877_v60 }
  0xde   :  { %700 = vtanh.f32 %v168_v32  ;;  %v287_v32 = vsub.s32 1, %v877_v60 }
  0xe2   :  { %v687_v34 = vpop.eup %686 }
  0xe3   :  { %v187_v35 = vmul.f32 %v687_v34, %v621_v33  ;;  %v295_v34 = vsub.s32 3, %v877_v60 }
  0xe4   :  { %v689_v36 = vpop.eup %688 }
  0xe5   :  { %v198_v37 = vsel %vm194_vm1, %v187_v35, 0.0  ;;  %v186_v38 = vmul.f32 %v689_v36, %v621_v33 }
  0xe6   :  { %v691_v39 = vpop.eup %690  ;;  %199 = vadd.xlane.f32.xlu0 %v198_v37 }
  0xe7   :  { %v693_v40 = vpop.eup %692  ;;  %v189_v41 = vmul.f32 %v691_v39, %v621_v33  ;;  %v195_v46 = vsel %vm194_vm1, %v186_v38, 0.0  ;;  %v299_v39 = vsub.s32 4, %v877_v60 }
  0xe8   :  { %v695_v42 = vpop.eup %694  ;;  %v190_v43 = vmul.f32 %v693_v40, %v621_v33 }
  0xe9   :  { %v697_v44 = vpop.eup %696  ;;  %v204_v45 = vsel %vm194_vm1, %v189_v41, 0.0  ;;  %v188_v47 = vmul.f32 %v695_v42, %v621_v33 }
  0xea   :  { %v699_v48 = vpop.eup %698  ;;  %205 = vadd.xlane.f32.xlu1 %v204_v45  ;;  %196 = vadd.xlane.f32.xlu0 %v195_v46  ;;  %v207_v49 = vsel %vm194_vm1, %v190_v43, 0.0  ;;  %v191_v52 = vmul.f32 %v697_v44, %v621_v33  ;;  %v303_v46 = vsub.s32 5, %v877_v60 }
  0xeb   :  { %v192_v50 = vmul.f32 %v699_v48, %v621_v33  ;;  %v201_v51 = vsel %vm194_vm1, %v188_v47, 0.0  ;;  %v701_v53 = vpop.eup %700 }
  0xec   :  { %v210_v55 = vsel %vm194_vm1, %v191_v52, 0.0  ;;  %v193_v56 = vmul.f32 %v701_v53, %v621_v33  ;;  %v291_v33 = vsub.s32 2, %v877_v60 }
  0xed   :  { %v213_v54 = vsel %vm194_vm1, %v192_v50, 0.0  ;;  %v307_v50 = vsub.s32 6, %v877_v60 }
  0xee   :  { %202 = vadd.xlane.f32.xlu1 %v201_v51  ;;  %208 = vadd.xlane.f32.xlu0 %v207_v49  ;;  %v216_v57 = vsel %vm194_vm1, %v193_v56, 0.0 }
  0xf2   :  { %211 = vadd.xlane.f32.xlu1 %v210_v55  ;;  %214 = vadd.xlane.f32.xlu0 %v213_v54  ;;  %v311_v54 = vsub.s32 7, %v877_v60 }
  0xf6   :  { %217 = vadd.xlane.f32.xlu1 %v216_v57 }
 0x16f   :  { %v200_v61 = vpop.xlane.xlu0 %199 }
 0x170   :  { %v236_v2 = vrot.slane %v200_v61, %v880_v62 }
 0x173   :  { %v206_v63 = vpop.xlane.xlu1 %205  ;;  %v197_v0 = vpop.xlane.xlu0 %196 }
 0x174   :  { %v232_v1 = vrot.slane %v197_v0, %v880_v62  ;;  %v244_v8 = vrot.slane %v206_v63, %v880_v62 }
 0x176   :  { %v262_v16 = vsel %vm261_vm2, %v236_v2, %v232_v1 }
 0x177   :  { %v203_v3 = vpop.xlane.xlu1 %202  ;;  %v209_v4 = vpop.xlane.xlu0 %208 }
 0x178   :  { %v240_v6 = vrot.slane %v203_v3, %v880_v62  ;;  %v248_v7 = vrot.slane %v209_v4, %v880_v62 }
 0x17a   :  { %v264_v17 = vsel %vm263_vm3, %v240_v6, %v262_v16 }
 0x17b   :  { %v266_v18 = vsel %vm265_vm4, %v244_v8, %v264_v17  ;;  %v212_v19 = vpop.xlane.xlu1 %211  ;;  %v215_v20 = vpop.xlane.xlu0 %214 }
 0x17c   :  { %v268_v21 = vsel %vm267_vm5, %v248_v7, %v266_v18  ;;  %v252_v22 = vrot.slane %v212_v19, %v880_v62  ;;  %v256_v23 = vrot.slane %v215_v20, %v880_v62 }
 0x17e   :  { %v270_v24 = vsel %vm269_vm6, %v252_v22, %v268_v21 }
 0x17f   :  { %v218_v25 = vpop.xlane.xlu1 %217  ;;  %v272_v27 = vsel %vm271_vm7, %v256_v23, %v270_v24 }
 0x180   :  { %v260_v26 = vrot.slane %v218_v25, %v880_v62 }
 0x182   :  { %v274_v28 = vsel %vm273_vm8, %v260_v26, %v272_v27 }
 0x183   :  { %v277_v29 = vsel %vm276_vm9, %v274_v28, -inf }
 0x184   :  { %278 = vmax.xlane.f32.xlu0 %v277_v29 }
 0x20d   :  { %v279_v35 = vpop.xlane.xlu0 %278 }
 0x20e   :  { %v284_v36 = vrot.slane %v279_v35, %v283_v31  ;;  %v288_v37 = vrot.slane %v279_v35, %v287_v32  ;;  %v292_v38 = vrot.slane %v279_v35, %v291_v33  ;;  %v296_v40 = vrot.slane %v279_v35, %v295_v34 }
 0x20f   :  { %v300_v47 = vrot.slane %v279_v35, %v299_v39  ;;  %v304_v51 = vrot.slane %v279_v35, %v303_v46  ;;  %v308_v55 = vrot.slane %v279_v35, %v307_v50  ;;  %v312_v58 = vrot.slane %v279_v35, %v311_v54 }
 0x210   :  { %v321_v41 = vsub.f32 %v197_v0, %v284_v36  ;;  %v322_v42 = vsub.f32 %v200_v61, %v288_v37  ;;  %v323_v43 = vsub.f32 %v203_v3, %v292_v38  ;;  %v324_v48 = vsub.f32 %v206_v63, %v296_v40 }
 0x211   :  { %v325_v52 = vsub.f32 %v209_v4, %v300_v47  ;;  %v326_v56 = vsub.f32 %v212_v19, %v304_v51  ;;  %v327_v59 = vsub.f32 %v215_v20, %v308_v55  ;;  %v328_v1 = vsub.f32 %v218_v25, %v312_v58 }
 0x212   :  { %v329_v44 = vmul.f32 1.442695, %v321_v41  ;;  %v331_v45 = vmul.f32 1.442695, %v322_v42  ;;  %v333_v49 = vmul.f32 1.442695, %v323_v43 }
 0x213   :  { %v335_v53 = vmul.f32 1.442695, %v324_v48  ;;  %v337_v57 = vmul.f32 1.442695, %v325_v52  ;;  %v339_v61 = vmul.f32 1.442695, %v326_v56 }
 0x214   :  { %702 = vpow2.f32 %v329_v44  ;;  %v341_v2 = vmul.f32 1.442695, %v327_v59  ;;  %v343_v4 = vmul.f32 1.442695, %v328_v1 }
 0x215   :  { %704 = vpow2.f32 %v331_v45 }
 0x216   :  { %706 = vpow2.f32 %v333_v49 }
 0x217   :  { %708 = vpow2.f32 %v335_v53 }
 0x218   :  { %710 = vpow2.f32 %v337_v57 }
 0x219   :  { %712 = vpow2.f32 %v339_v61 }
 0x21a   :  { %714 = vpow2.f32 %v341_v2 }
 0x21b   :  { %716 = vpow2.f32 %v343_v4 }
 0x221   :  { %v703_v63 = vpop.eup %702 }
 0x222   :  { %v922_v0 = vpop.eup %704  ;;  %354 = vperm.xlu1 %684, %v703_v63  }
 0x223   :  { %357 = vperm.xlu0 %685, %v922_v0   ;;  %v925_v3 = vpop.eup %706 }
 0x224   :  { %v928_v6 = vpop.eup %708 }
 0x225   :  { %v931_v7 = vpop.eup %710 }
 0x226   :  { %360 = vperm.xlu1 %684, %v925_v3   ;;  %v934_v8 = vpop.eup %712 }
 0x227   :  { %v937_v16 = vpop.eup %714 }
 0x228   :  { %v940_v17 = vpop.eup %716 }
 0x22a   :  { %363 = vperm.xlu1 %684, %v928_v6  }
 0x22e   :  { %366 = vperm.xlu1 %684, %v931_v7  }
 0x232   :  { %369 = vperm.xlu1 %684, %v934_v8  }
 0x236   :  { %372 = vperm.xlu1 %684, %v937_v16  }
 0x23a   :  { %375 = vperm.xlu1 %684, %v940_v17  }
 0x29d   :  { %v355_v18 = vpop.permute.xlu1 %354 }
 0x29e   :  { %v358_v22 = vpop.permute.xlu0 %357  ;;  %v380_v25 = vrot.slane %v355_v18, %v880_v62 }
 0x29f   :  { %v384_v24 = vrot.slane %v358_v22, %v880_v62 }
 0x2a1   :  { %v361_v19 = vpop.permute.xlu1 %360  ;;  %v409_v30 = vsel %vm261_vm2, %v384_v24, %v380_v25 }
 0x2a2   :  { %v388_v26 = vrot.slane %v361_v19, %v880_v62 }
 0x2a4   :  { %v410_v36 = vsel %vm263_vm3, %v388_v26, %v409_v30 }
 0x2a5   :  { %v364_v20 = vpop.permute.xlu1 %363 }
 0x2a6   :  { %v392_v27 = vrot.slane %v364_v20, %v880_v62 }
 0x2a8   :  { %v411_v38 = vsel %vm265_vm4, %v392_v27, %v410_v36 }
 0x2a9   :  { %v367_v21 = vpop.permute.xlu1 %366 }
 0x2aa   :  { %v396_v28 = vrot.slane %v367_v21, %v880_v62 }
 0x2ac   :  { %v412_v40 = vsel %vm267_vm5, %v396_v28, %v411_v38 }
 0x2ad   :  { %v370_v23 = vpop.permute.xlu1 %369 }
 0x2ae   :  { %v400_v35 = vrot.slane %v370_v23, %v880_v62 }
 0x2b0   :  { %v413_v42 = vsel %vm269_vm6, %v400_v35, %v412_v40 }
 0x2b1   :  { %v373_v29 = vpop.permute.xlu1 %372 }
 0x2b2   :  { %v404_v37 = vrot.slane %v373_v29, %v880_v62 }
 0x2b4   :  { %v414_v44 = vsel %vm271_vm7, %v404_v37, %v413_v42 }
 0x2b5   :  { %v376_v41 = vpop.permute.xlu1 %375 }
 0x2b6   :  { %v408_v43 = vrot.slane %v376_v41, %v880_v62 }
 0x2b8   :  { %v415_v45 = vsel %vm273_vm8, %v408_v43, %v414_v44 }
 0x2b9   :  { %v417_v47 = vsel %vm276_vm9, %v415_v45, 0.0 }
 0x2ba   :  { %418 = vadd.xlane.f32.xlu1 %v417_v47 }
 0x343   :  { %v419_v48 = vpop.xlane.xlu1 %418 }
 0x344   :  { %v424_v49 = vrot.slane %v419_v48, %v283_v31  ;;  %v428_v51 = vrot.slane %v419_v48, %v287_v32  ;;  %v432_v52 = vrot.slane %v419_v48, %v291_v33  ;;  %v436_v62 = vrot.slane %v419_v48, %v295_v34 }
 0x345   :  { %v440_v53 = vrot.slane %v419_v48, %v299_v39  ;;  %v444_v31 = vrot.slane %v419_v48, %v303_v46  ;;  %v448_v33 = vrot.slane %v419_v48, %v307_v50  ;;  %v452_v39 = vrot.slane %v419_v48, %v311_v54 }
 0x346   :  { %718 = vrcp.f32 %v424_v49 }
 0x347   :  { %720 = vrcp.f32 %v428_v51 }
 0x348   :  { %722 = vrcp.f32 %v432_v52 }
 0x349   :  { %724 = vrcp.f32 %v436_v62 }
 0x34a   :  { %726 = vrcp.f32 %v440_v53 }
 0x34b   :  { %728 = vrcp.f32 %v444_v31 }
 0x34c   :  { %730 = vrcp.f32 %v448_v33 }
 0x34d   :  { %732 = vrcp.f32 %v452_v39 }
 0x353   :  { %v719_v55 = vpop.eup %718 }
 0x354   :  { %v462_v56 = vmul.f32 %v719_v55, %v703_v63  ;;  %v721_v32 = vpop.eup %720 }
 0x355   :  { %v464_v57 = vmul.f32 %v721_v32, %v922_v0  ;;  %v723_v34 = vpop.eup %722 }
 0x356   :  { %479 = vperm.xlu0 %685, %v462_v56   ;;  %v466_v58 = vmul.f32 %v723_v34, %v925_v3  ;;  %v725_v59 = vpop.eup %724 }
 0x357   :  { %v468_v46 = vmul.f32 %v725_v59, %v928_v6  ;;  %v727_v61 = vpop.eup %726 }
 0x358   :  { %v470_v50 = vmul.f32 %v727_v61, %v931_v7  ;;  %v729_v63 = vpop.eup %728 }
 0x359   :  { %v472_v0 = vmul.f32 %v729_v63, %v934_v8  ;;  %v731_v1 = vpop.eup %730 }
 0x35a   :  { %484 = vperm.xlu0 %685, %v464_v57   ;;  %v474_v60 = vmul.f32 %v731_v1, %v937_v16  ;;  %v733_v54 = vpop.eup %732 }
 0x35b   :  { %v476_v2 = vmul.f32 %v733_v54, %v940_v17 }
 0x35e   :  { %489 = vperm.xlu0 %685, %v466_v58  }
 0x362   :  { %494 = vperm.xlu0 %685, %v468_v46  }
 0x366   :  { %499 = vperm.xlu0 %685, %v470_v50  }
 0x36a   :  { %504 = vperm.xlu0 %685, %v472_v0  }
 0x36e   :  { %509 = vperm.xlu0 %685, %v474_v60  }
 0x372   :  { %514 = vperm.xlu0 %685, %v476_v2  }
 0x3d1   :  { %v480_v3 = vpop.permute.xlu0 %479 }
 0x3d2   :  { %v517_v7 = vmul.f32 %v480_v3, %v801_v5 }
 0x3d4   :  { %v525_v16 = vsel %vm41_vm0, %v517_v7, 0.0 }
 0x3d5   :  { %v485_v4 = vpop.permute.xlu0 %484  ;;  %v526_v25 = vrot.slane %v525_v16, 4 }
 0x3d6   :  { %v518_v6 = vmul.f32 %v485_v4, %v817_v9 }
 0x3d7   :  { %v527_v29 = vadd.f32 %v526_v25, %v525_v16 }
 0x3d8   :  { %v532_v8 = vsel %vm41_vm0, %v518_v6, 0.0 }
 0x3d9   :  { %v490_v18 = vpop.permute.xlu0 %489  ;;  %v533_v17 = vrot.slane %v532_v8, 4  ;;  %v528_v42 = vrot.slane %v527_v29, 2 }
 0x3da   :  { %v519_v19 = vmul.f32 %v490_v18, %v822_v10 }
 0x3db   :  { %v534_v27 = vadd.f32 %v533_v17, %v532_v8  ;;  %v529_v62 = vadd.f32 %v528_v42, %v527_v29 }
 0x3dc   :  { %v539_v20 = vsel %vm41_vm0, %v519_v19, 0.0 }
 0x3dd   :  { %v495_v21 = vpop.permute.xlu0 %494  ;;  %v540_v23 = vrot.slane %v539_v20, 4 }
 0x3de   :  { %v520_v22 = vmul.f32 %v495_v21, %v846_v14  ;;  %v535_v14 = vrot.slane %v534_v27, 2 }
 0x3df   :  { %v541_v10 = vadd.f32 %v540_v23, %v539_v20 }
 0x3e0   :  { %v546_v24 = vsel %vm41_vm0, %v520_v22, 0.0  ;;  %v536_v48 = vadd.f32 %v535_v14, %v534_v27 }
 0x3e1   :  { %v547_v9 = vrot.slane %v546_v24, 4  ;;  %v500_v26 = vpop.permute.xlu0 %499  ;;  %v542_v40 = vrot.slane %v541_v10, 2 }
 0x3e2   :  { %v521_v5 = vmul.f32 %v500_v26, %v827_v11  ;;  %v537_v33 = vrot.slane %v536_v48, 1 }
 0x3e3   :  { %v548_v30 = vadd.f32 %v547_v9, %v546_v24  ;;  %v543_v51 = vadd.f32 %v542_v40, %v541_v10 }
 0x3e4   :  { %v553_v28 = vsel %vm41_vm0, %v521_v5, 0.0  ;;  %v538_v63 = vadd.f32 %v537_v33, %v536_v48 }
 0x3e5   :  { %v554_v35 = vrot.slane %v553_v28, 4  ;;  %v505_v36 = vpop.permute.xlu0 %504  ;;  %v549_v43 = vrot.slane %v548_v30, 2  ;;  %v544_v39 = vrot.slane %v543_v51, 1 }
 0x3e6   :  { %v522_v37 = vmul.f32 %v505_v36, %v832_v12 }
 0x3e7   :  { %v555_v38 = vadd.f32 %v554_v35, %v553_v28  ;;  %v550_v53 = vadd.f32 %v549_v43, %v548_v30  ;;  %v545_v54 = vadd.f32 %v544_v39, %v543_v51 }
 0x3e8   :  { %v560_v41 = vsel %vm41_vm0, %v522_v37, 0.0 }
 0x3e9   :  { %v561_v44 = vrot.slane %v560_v41, 4  ;;  %v510_v45 = vpop.permute.xlu0 %509  ;;  %v556_v11 = vrot.slane %v555_v38, 2  ;;  %v551_v59 = vrot.slane %v550_v53, 1 }
 0x3ea   :  { %v523_v47 = vmul.f32 %v510_v45, %v839_v13  ;;  %v530_v13 = vrot.slane %v529_v62, 1 }
 0x3eb   :  { %v562_v49 = vadd.f32 %v561_v44, %v560_v41  ;;  %v557_v56 = vadd.f32 %v556_v11, %v555_v38  ;;  %v552_v3 = vadd.f32 %v551_v59, %v550_v53 }
 0x3ec   :  { %v567_v52 = vsel %vm41_vm0, %v523_v47, 0.0  ;;  %v531_v2 = vadd.f32 %v530_v13, %v529_v62 }
 0x3ed   :  { %v563_v12 = vrot.slane %v562_v49, 2  ;;  %v568_v55 = vrot.slane %v567_v52, 4  ;;  %v515_v31 = vpop.permute.xlu0 %514  ;;  %v558_v50 = vrot.slane %v557_v56, 1 }
 0x3ee   :  { %v524_v32 = vmul.f32 %v515_v31, %v857_v15  ;;  %v589_v18 = vsel %vm261_vm2, %v538_v63, %v531_v2 }
 0x3ef   :  { %v564_v57 = vadd.f32 %v563_v12, %v562_v49  ;;  %v569_v34 = vadd.f32 %v568_v55, %v567_v52  ;;  %v559_v6 = vadd.f32 %v558_v50, %v557_v56  ;;  %v590_v8 = vsel %vm263_vm3, %v545_v54, %v589_v18 }
 0x3f0   :  { %v574_v58 = vsel %vm41_vm0, %v524_v32, 0.0  ;;  %v591_v16 = vsel %vm265_vm4, %v552_v3, %v590_v8 }
 0x3f1   :  { %v570_v46 = vrot.slane %v569_v34, 2  ;;  %v575_v61 = vrot.slane %v574_v58, 4  ;;  %v565_v0 = vrot.slane %v564_v57, 1  ;;  %v592_v22 = vsel %vm267_vm5, %v559_v6, %v591_v16 }
 0x3f3   :  { %v571_v1 = vadd.f32 %v570_v46, %v569_v34  ;;  %v576_v60 = vadd.f32 %v575_v61, %v574_v58  ;;  %v566_v7 = vadd.f32 %v565_v0, %v564_v57 }
 0x3f5   :  { %v572_v4 = vrot.slane %v571_v1, 1  ;;  %v577_v15 = vrot.slane %v576_v60, 2  ;;  %v593_v23 = vsel %vm269_vm6, %v566_v7, %v592_v22 }
 0x3f7   :  { %v578_v19 = vadd.f32 %v577_v15, %v576_v60  ;;  %v573_v20 = vadd.f32 %v572_v4, %v571_v1 }
 0x3f9   :  { %v579_v21 = vrot.slane %v578_v19, 1  ;;  %v594_v24 = vsel %vm271_vm7, %v573_v20, %v593_v23 }
 0x3fb   :  { %v580_v17 = vadd.f32 %v579_v21, %v578_v19 }
 0x3fd   :  { %v595_v25 = vsel %vm273_vm8, %v580_v17, %v594_v24 }
 0x3fe   :  { %597 = vst.msk [vmem:[#allocation2] sm:$0xff] %vm41_vm0, %v595_v25 }
 0x3ff   :  { %745 = shalt.err (!%p742_p4)
}
 0x400   :  { %607 = dma.vmem_to_hbm [thread:$0]  %s605_s22, 128, %s1013_s4, [#allocation3]  }
 0x401   :  { %754 = dma.done.wait [#allocation3], 128  }
 0x402   :  { %755 = vsyncadd [#allocation3], 4294967168 }
 0x403   :  { %611 = vsyncpa [#allocation3], 1 }

</bundles_post_ra>
